<compile_context>
chip_gen: v7x
topology: tpu7x:2x2x1
jax: 0.10.0
libtpu: 0.0.40
codegen_flags: <defaults>
</compile_context>

<pallas_src>
import functools

import jax
import jax.numpy as jnp
from jax.experimental import pallas as pl
from jax.experimental.pallas import tpu as pltpu

LANE = 128


def _round_up(n, m):
    return ((n + m - 1) // m) * m


def _pad_to(a, shape):
    pads = [(0, t - s) for s, t in zip(a.shape, shape)]
    return jnp.pad(a, pads)


def _mlp_kernel(x_ref, w1_ref, w2_ref, w3_ref, o_ref, *, num_classes):
    # fc1 -> (dropout: identity in eval) -> relu1   (bf16 operands, f32 accumulation)
    h1 = jnp.dot(x_ref[...], w1_ref[...], preferred_element_type=jnp.float32)
    h1 = jnp.maximum(h1, 0.0)
    # fc2 -> relu2
    h2 = jnp.dot(h1.astype(jnp.bfloat16), w2_ref[...],
                 preferred_element_type=jnp.float32)
    h2 = jnp.maximum(h2, 0.0)
    # fc3 -> relu3
    h3 = jnp.dot(h2.astype(jnp.bfloat16), w3_ref[...],
                 preferred_element_type=jnp.float32)
    h3 = jnp.maximum(h3, 0.0)

    # log_softmax over the (padded) class axis; padded columns masked out so they
    # contribute nothing to the max / sum reductions.
    col = jax.lax.broadcasted_iota(jnp.int32, h3.shape, 1)
    logits = jnp.where(col < num_classes, h3, jnp.float32(-1e30))
    m = jnp.max(logits, axis=-1, keepdims=True)
    shifted = logits - m
    lse = jnp.log(jnp.sum(jnp.exp(shifted), axis=-1, keepdims=True))
    o_ref[...] = (shifted - lse).astype(o_ref.dtype)


def neural_net_forward(x, w1_t, w2_t, w3_t, *, tile_b=256):
    """x: [B, input_size] f32; w*_t: [in, out] f32 (transposed from PyTorch layout)."""
    B, in_f = x.shape
    h1_f = w1_t.shape[1]
    h2_f = w2_t.shape[1]
    nc = w3_t.shape[1]

    # Pad every feature dim to a lane multiple (128) -> lane-dense matmuls and stores.
    in_p = _round_up(in_f, LANE)
    h1_p = _round_up(h1_f, LANE)
    h2_p = _round_up(h2_f, LANE)
    nc_p = _round_up(nc, LANE)

    # Batch tile: big (256) for real batches, sublane-aligned (mult of 8) for small ones.
    tb = tile_b if B >= tile_b else _round_up(B, 8)
    B_p = _round_up(B, tb)

    # bf16 operands (MXU-native on v5e/v6e/v7x); accumulation stays f32 in-kernel.
    x_p = _pad_to(x, (B_p, in_p)).astype(jnp.bfloat16)
    w1_p = _pad_to(w1_t, (in_p, h1_p)).astype(jnp.bfloat16)
    w2_p = _pad_to(w2_t, (h1_p, h2_p)).astype(jnp.bfloat16)
    w3_p = _pad_to(w3_t, (h2_p, nc_p)).astype(jnp.bfloat16)

    grid = (B_p // tb,)

    flops = 2 * B_p * (in_p * h1_p + h1_p * h2_p + h2_p * nc_p)
    bytes_accessed = 2 * (x_p.size + w1_p.size + w2_p.size + w3_p.size) + 4 * B_p * nc_p

    out = pl.pallas_call(
        functools.partial(_mlp_kernel, num_classes=nc),
        out_shape=jax.ShapeDtypeStruct((B_p, nc_p), jnp.float32),
        grid=grid,
        in_specs=[
            pl.BlockSpec((tb, in_p), lambda i: (i, 0)),      # x tile streams per step
            pl.BlockSpec((in_p, h1_p), lambda i: (0, 0)),    # weights stay resident
            pl.BlockSpec((h1_p, h2_p), lambda i: (0, 0)),
            pl.BlockSpec((h2_p, nc_p), lambda i: (0, 0)),
        ],
        out_specs=pl.BlockSpec((tb, nc_p), lambda i: (i, 0)),
        compiler_params=pltpu.CompilerParams(
            dimension_semantics=("parallel",),               # megacore on v7x
            vmem_limit_bytes=32 * 1024 * 1024,               # safe on v5e/v6e/v7x
        ),
        cost_estimate=pl.CostEstimate(
            flops=flops,
            transcendentals=B_p * nc_p,
            bytes_accessed=bytes_accessed,
        ),
    )(x_p, w1_p, w2_p, w3_p)

    return out[:B, :nc]


def reference_forward(x, w1_t, w2_t, w3_t):
    """Pure-JAX reference mirroring the kernel's bf16-operand / f32-accumulate math."""
    def dot_bf16(a, b):
        return jnp.dot(a.astype(jnp.bfloat16), b.astype(jnp.bfloat16),
                       preferred_element_type=jnp.float32)

    h1 = jnp.maximum(dot_bf16(x, w1_t), 0.0)
    h2 = jnp.maximum(dot_bf16(h1, w2_t), 0.0)
    h3 = jnp.maximum(dot_bf16(h2, w3_t), 0.0)
    return jax.nn.log_softmax(h3, axis=1)


if __name__ == "__main__":
    # Small shapes consistent with NeuralNet(input_size, h1, h2, num_classes).
    batch = 8
    input_size = 32
    hidden1_size = 64
    hidden2_size = 32
    num_classes = 16

    key = jax.random.PRNGKey(0)
    kx, k1, k2, k3 = jax.random.split(key, 4)

    x = jax.random.normal(kx, (batch, input_size), dtype=jnp.float32)

    # PyTorch nn.Linear weights are (out, in); transpose to (in, out) for x @ W.
    w1 = jax.random.normal(k1, (hidden1_size, input_size), dtype=jnp.float32) * 0.1
    w2 = jax.random.normal(k2, (hidden2_size, hidden1_size), dtype=jnp.float32) * 0.1
    w3 = jax.random.normal(k3, (num_classes, hidden2_size), dtype=jnp.float32) * 0.1
    w1_t, w2_t, w3_t = w1.T, w2.T, w3.T

    out = neural_net_forward(x, w1_t, w2_t, w3_t)
    out = jax.block_until_ready(out)

    ref = reference_forward(x, w1_t, w2_t, w3_t)
    assert out.shape == (batch, num_classes)
    assert jnp.allclose(out, ref, atol=2e-3, rtol=2e-3), "mismatch vs reference"

    print("KERNEL_OK")
</pallas_src>

<mosaic_0001>
module attributes {stable_mosaic.version = 11 : i64} {
  func.func @_mlp_kernel(%arg0: i32, %arg1: memref<8x128xbf16, #tpu.memory_space<vmem>>, %arg2: memref<128x128xbf16, #tpu.memory_space<vmem>>, %arg3: memref<128x128xbf16, #tpu.memory_space<vmem>>, %arg4: memref<128x128xbf16, #tpu.memory_space<vmem>>, %arg5: memref<8x128xf32, #tpu.memory_space<vmem>>) attributes {dimension_semantics = [#tpu.dimension_semantics<parallel>], iteration_bounds = array<i64: 1>, scalar_prefetch = 0 : i64, scratch_operands = 0 : i64, tpu.core_type = #tpu.core_type<tc>, window_params = [{transform_indices = @transform_0, window_bounds = array<i64: 8, 128>}, {pipeline_mode = #tpu.pipeline_mode<synchronous>, transform_indices = @transform_1, window_bounds = array<i64: 128, 128>}, {pipeline_mode = #tpu.pipeline_mode<synchronous>, transform_indices = @transform_2, window_bounds = array<i64: 128, 128>}, {pipeline_mode = #tpu.pipeline_mode<synchronous>, transform_indices = @transform_3, window_bounds = array<i64: 128, 128>}, {transform_indices = @transform_4, window_bounds = array<i64: 8, 128>}]} {
    %c0 = arith.constant 0 : index
    %c0_0 = arith.constant 0 : index
    %0 = vector.load %arg1[%c0, %c0_0] : memref<8x128xbf16, #tpu.memory_space<vmem>>, vector<8x128xbf16>
    %c0_1 = arith.constant 0 : index
    %c0_2 = arith.constant 0 : index
    %1 = vector.load %arg2[%c0_1, %c0_2] : memref<128x128xbf16, #tpu.memory_space<vmem>>, vector<128x128xbf16>
    %cst = arith.constant dense<0.000000e+00> : vector<8x128xf32>
    %2 = tpu.matmul %0, %1, %cst {dimension_numbers = #tpu.dot_dimension_numbers<[1], [0], [0], [1], [0, 0, 1, 1], [], []>} : vector<8x128xbf16>, vector<128x128xbf16>, vector<8x128xf32> -> vector<8x128xf32>
    %cst_3 = arith.constant 0.000000e+00 : f32
    %3 = vector.broadcast %cst_3 : f32 to vector<8x128xf32>
    %4 = arith.maximumf %2, %3 : vector<8x128xf32>
    %5 = arith.truncf %4 : vector<8x128xf32> to vector<8x128xbf16>
    %c0_4 = arith.constant 0 : index
    %c0_5 = arith.constant 0 : index
    %6 = vector.load %arg3[%c0_4, %c0_5] : memref<128x128xbf16, #tpu.memory_space<vmem>>, vector<128x128xbf16>
    %cst_6 = arith.constant dense<0.000000e+00> : vector<8x128xf32>
    %7 = tpu.matmul %5, %6, %cst_6 {dimension_numbers = #tpu.dot_dimension_numbers<[1], [0], [0], [1], [0, 0, 1, 1], [], []>} : vector<8x128xbf16>, vector<128x128xbf16>, vector<8x128xf32> -> vector<8x128xf32>
    %cst_7 = arith.constant 0.000000e+00 : f32
    %8 = vector.broadcast %cst_7 : f32 to vector<8x128xf32>
    %9 = arith.maximumf %7, %8 : vector<8x128xf32>
    %10 = arith.truncf %9 : vector<8x128xf32> to vector<8x128xbf16>
    %c0_8 = arith.constant 0 : index
    %c0_9 = arith.constant 0 : index
    %11 = vector.load %arg4[%c0_8, %c0_9] : memref<128x128xbf16, #tpu.memory_space<vmem>>, vector<128x128xbf16>
    %cst_10 = arith.constant dense<0.000000e+00> : vector<8x128xf32>
    %12 = tpu.matmul %10, %11, %cst_10 {dimension_numbers = #tpu.dot_dimension_numbers<[1], [0], [0], [1], [0, 0, 1, 1], [], []>} : vector<8x128xbf16>, vector<128x128xbf16>, vector<8x128xf32> -> vector<8x128xf32>
    %cst_11 = arith.constant 0.000000e+00 : f32
    %13 = vector.broadcast %cst_11 : f32 to vector<8x128xf32>
    %14 = arith.maximumf %12, %13 : vector<8x128xf32>
    %15 = tpu.iota {dimensions = array<i32: 1>} : vector<8x128xi32>
    %c16_i32 = arith.constant 16 : i32
    %16 = vector.broadcast %c16_i32 : i32 to vector<8x128xi32>
    %17 = arith.cmpi slt, %15, %16 : vector<8x128xi32>
    %cst_12 = arith.constant -1.000000e+30 : f32
    %18 = vector.broadcast %cst_12 : f32 to vector<8x128xf32>
    %19 = arith.select %17, %14, %18 : vector<8x128xi1>, vector<8x128xf32>
    %cst_13 = arith.constant dense<0xFF800000> : vector<8xf32>
    %20 = vector.multi_reduction <maximumf>, %19, %cst_13 [1] : vector<8x128xf32> to vector<8xf32>
    %21 = vector.shape_cast %20 : vector<8xf32> to vector<8x1xf32>
    %22 = vector.broadcast %21 : vector<8x1xf32> to vector<8x128xf32>
    %23 = arith.subf %19, %22 : vector<8x128xf32>
    %24 = math.exp %23 : vector<8x128xf32>
    %cst_14 = arith.constant dense<0.000000e+00> : vector<8xf32>
    %25 = vector.multi_reduction <add>, %24, %cst_14 [1] : vector<8x128xf32> to vector<8xf32>
    %26 = vector.shape_cast %25 : vector<8xf32> to vector<8x1xf32>
    %27 = math.log %26 : vector<8x1xf32>
    %28 = vector.broadcast %27 : vector<8x1xf32> to vector<8x128xf32>
    %29 = arith.subf %23, %28 : vector<8x128xf32>
    %c0_15 = arith.constant 0 : index
    %c0_16 = arith.constant 0 : index
    %30 = vector.load %arg5[%c0_15, %c0_16] : memref<8x128xf32, #tpu.memory_space<vmem>>, vector<8x128xf32>
    tpu.vector_store %arg5[%c0_15, %c0_16], %29 {strides = array<i32>} : memref<8x128xf32, #tpu.memory_space<vmem>>, vector<8x128xf32>,
    return
  }
  func.func @transform_0(%arg0: i32) -> (i32, i32) {
    %c0_i32 = arith.constant 0 : i32
    %c0_i32_0 = arith.constant 0 : i32
    return %arg0, %c0_i32 : i32, i32
  }
  func.func @transform_1(%arg0: i32) -> (i32, i32) {
    %c0_i32 = arith.constant 0 : i32
    %c0_i32_0 = arith.constant 0 : i32
    %c0_i32_1 = arith.constant 0 : i32
    return %c0_i32, %c0_i32_0 : i32, i32
  }
  func.func @transform_2(%arg0: i32) -> (i32, i32) {
    %c0_i32 = arith.constant 0 : i32
    %c0_i32_0 = arith.constant 0 : i32
    %c0_i32_1 = arith.constant 0 : i32
    return %c0_i32, %c0_i32_0 : i32, i32
  }
  func.func @transform_3(%arg0: i32) -> (i32, i32) {
    %c0_i32 = arith.constant 0 : i32
    %c0_i32_0 = arith.constant 0 : i32
    %c0_i32_1 = arith.constant 0 : i32
    return %c0_i32, %c0_i32_0 : i32, i32
  }
  func.func @transform_4(%arg0: i32) -> (i32, i32) {
    %c0_i32 = arith.constant 0 : i32
    %c0_i32_0 = arith.constant 0 : i32
    return %arg0, %c0_i32 : i32, i32
  }
}

</mosaic_0001>

<bundles_post_ra>
// kernel: tpu_custom_call.1
= control target key start
LH: loop header
LB: loop body
LE: loop exit
PB: predicated region body
PF: predicated region fallthrough
CT: control target
= control target key end

     0   :  { %9 = vsyncpa [#allocation3], 0  ;;  %s821_s0 = inlined_call_operand.hbm [shape: bf16[8,128], index: 0, kind: input, shape index: {}]   ;;  %s822_s1 = inlined_call_operand.hbm [shape: bf16[128,128], index: 1, kind: input, shape index: {}]   ;;  %s823_s2 = inlined_call_operand.hbm [shape: bf16[128,128], index: 2, kind: input, shape index: {}]   ;;  %s824_s3 = inlined_call_operand.hbm [shape: bf16[128,128], index: 3, kind: input, shape index: {}]   ;;  %s825_s4 = inlined_call_operand.hbm [shape: f32[8,128], index: 4, kind: output, shape index: {}]  }
   0x1   :  { %10 = vsyncpa [#allocation6], 0 }
   0x2   :  { %11 = vsyncpa [#allocation9], 0 }
   0x3   :  { %12 = vsyncpa [#allocation4], 0  ;;  %s688_s15 = smov [#allocation5]   ;;  %s570_s19 = scalar_lea.hbm %s822_s1, 1024 }
   0x4   :  { %s28_s16 = sshll.u32 %s688_s15, 4  ;;  %p571_p0 = scmp.ne.s32.totalorder %s822_s1, %s570_s19  ;;  %s29_s16 = int_to_ptr.vmem [resolvable:$true] %s28_s16 }
   0x5   :  { %p574_p1 = scmp.lt.u32.totalorder %s570_s19, %s822_s1 }
   0x7   :  { %p576_p2 = pnand %p574_p1, %p571_p0 }
   0x9   :  { %579 = shalt.err (!%p576_p2)
}
   0xa   :  { %s580_s24 = scalar_lea.vmem %s29_s16, 1024  ;;  %p585_p4 = scmp.lt.s32.totalorder %s29_s16, %s29_s16 }
   0xb   :  { %p581_p3 = scmp.ne.s32.totalorder %s29_s16, %s580_s24  ;;  %p586_p5 = scmp.lt.s32.totalorder %s580_s24, %s580_s24 }
   0xd   :  { %p587_p6 = por %p586_p5, %p585_p4 }
   0xf   :  { %p588_p7 = pnand %p587_p6, %p581_p3 }
  0x11   :  { %591 = shalt.err (!%p588_p7)
}
  0x12   :  { %s689_s25 = smov 64   ;;  %s690_s26 = smov 4  }
  0x13   :  { %34 = dma.hbm_to_vmem [thread:$0]  %s822_s1, 1024, %s29_s16, [#allocation6], %s689_s25, %s689_s25, %s690_s26  }
  0x14   :  { %s691_s29 = smov [#allocation2]   ;;  %s692_s5 = smov [#allocation7]  }
  0x15   :  { %s19_s30 = sshll.u32 %s691_s29, 4  ;;  %s40_s6 = sshll.u32 %s692_s5, 4  ;;  %s20_s30 = int_to_ptr.vmem [resolvable:$true] %s19_s30  ;;  %s41_s6 = int_to_ptr.vmem [resolvable:$true] %s40_s6 }
  0x16   :  { %s592_s9 = scalar_lea.hbm %s821_s0, 64 }
  0x17   :  { %p593_p8 = scmp.ne.s32.totalorder %s821_s0, %s592_s9  ;;  %p596_p9 = scmp.lt.u32.totalorder %s592_s9, %s821_s0 }
  0x19   :  { %p598_p10 = pnand %p596_p9, %p593_p8 }
  0x1b   :  { %601 = shalt.err (!%p598_p10)
}
  0x1c   :  { %s602_s1 = scalar_lea.vmem %s20_s30, 64  ;;  %p607_p12 = scmp.lt.s32.totalorder %s20_s30, %s20_s30 }
  0x1d   :  { %p603_p11 = scmp.ne.s32.totalorder %s20_s30, %s602_s1  ;;  %p608_p13 = scmp.lt.s32.totalorder %s602_s1, %s602_s1 }
  0x1f   :  { %p609_p0 = por %p608_p13, %p607_p12 }
  0x21   :  { %p610_p1 = pnand %p609_p0, %p603_p11 }
  0x23   :  { %613 = shalt.err (!%p610_p1)
}
  0x24   :  { %22 = dma.hbm_to_vmem [thread:$0]  %s821_s0, 64, %s20_s30, [#allocation3]  }
  0x25   :  { %s614_s18 = scalar_lea.hbm %s823_s2, 1024 }
  0x26   :  { %p615_p2 = scmp.ne.s32.totalorder %s823_s2, %s614_s18  ;;  %p618_p3 = scmp.lt.u32.totalorder %s614_s18, %s823_s2 }
  0x28   :  { %p620_p4 = pnand %p618_p3, %p615_p2 }
  0x2a   :  { %623 = shalt.err (!%p620_p4)
}
  0x2b   :  { %s624_s23 = scalar_lea.vmem %s41_s6, 1024  ;;  %p629_p6 = scmp.lt.s32.totalorder %s41_s6, %s41_s6 }
  0x2c   :  { %p625_p5 = scmp.ne.s32.totalorder %s41_s6, %s624_s23  ;;  %p630_p7 = scmp.lt.s32.totalorder %s624_s23, %s624_s23 }
  0x2e   :  { %p631_p8 = por %p630_p7, %p629_p6 }
  0x30   :  { %p632_p9 = pnand %p631_p8, %p625_p5 }
  0x32   :  { %635 = shalt.err (!%p632_p9)
}
  0x33   :  { %46 = dma.hbm_to_vmem [thread:$0]  %s823_s2, 1024, %s41_s6, [#allocation6], %s689_s25, %s689_s25, %s690_s26  }
  0x34   :  { %s693_s27 = smov [#allocation8]   ;;  %s636_s5 = scalar_lea.hbm %s824_s3, 1024 }
  0x35   :  { %s52_s28 = sshll.u32 %s693_s27, 4  ;;  %p637_p10 = scmp.ne.s32.totalorder %s824_s3, %s636_s5  ;;  %s53_s28 = int_to_ptr.vmem [resolvable:$true] %s52_s28 }
  0x36   :  { %p640_p11 = scmp.lt.u32.totalorder %s636_s5, %s824_s3 }
  0x38   :  { %p642_p12 = pnand %p640_p11, %p637_p10 }
  0x3a   :  { %645 = shalt.err (!%p642_p12)
}
  0x3b   :  { %s646_s11 = scalar_lea.vmem %s53_s28, 1024  ;;  %p651_p0 = scmp.lt.s32.totalorder %s53_s28, %s53_s28 }
  0x3c   :  { %p647_p13 = scmp.ne.s32.totalorder %s53_s28, %s646_s11  ;;  %p652_p1 = scmp.lt.s32.totalorder %s646_s11, %s646_s11 }
  0x3e   :  { %p653_p2 = por %p652_p1, %p651_p0 }
  0x40   :  { %p654_p3 = pnand %p653_p2, %p647_p13 }
  0x42   :  { %657 = shalt.err (!%p654_p3)
}
  0x43   :  { %58 = dma.hbm_to_vmem [thread:$0]  %s824_s3, 1024, %s53_s28, [#allocation9], %s689_s25, %s689_s25, %s690_s26  }
  0x44   :  { %680 = dma.done.wait [#allocation3], 64  }
  0x45   :  { %681 = vsyncadd [#allocation3], 4294967232 }
  0x46   :  { %682 = dma.done.wait [#allocation6], 2048  }
  0x47   :  { %683 = vsyncadd [#allocation6], 4294965248 }
  0x48   :  { %684 = dma.done.wait [#allocation9], 1024  }
  0x49   :  { %685 = vsyncadd [#allocation9], 4294966272  ;;  %v694_v0 = vmov 0.0   ;;  %vm695_vm0 = vmmov 0   ;;  %v542_v1 = vld [vmem:[#allocation5] sm:$0xff]   ;;  %v543_v2 = vld [vmem:[#allocation5 + $0x8] sm:$0xff]   ;;  %v390_v38 = vlaneseq }
  0x4a   :  { %473 = vmatprep.subr.bf16.mxu0 %v694_v0  ;;  %489 = vmatprep.mubr.msk.bf16.mxu0 %vm695_vm0, %v694_v0  ;;  %v544_v3 = vld [vmem:[#allocation5 + $0x10] sm:$0xff]   ;;  %v550_v4 = vld [vmem:[#allocation7] sm:$0xff]   ;;  %v545_v5 = vld [vmem:[#allocation5 + $0x18] sm:$0xff]   ;;  %s696_s3 = smov [#allocation10]  }
  0x4b   :  { %493 = vmatprep.subr.bf16.mxu1 %v694_v0  ;;  %509 = vmatprep.mubr.msk.bf16.mxu1 %vm695_vm0, %v694_v0  ;;  %v551_v6 = vld [vmem:[#allocation7 + $0x8] sm:$0xff]   ;;  %v546_v7 = vld [vmem:[#allocation5 + $0x20] sm:$0xff]   ;;  %v552_v8 = vld [vmem:[#allocation7 + $0x10] sm:$0xff]   ;;  %v391_v39 = vand.u32 127, %v390_v38  ;;  %s411_s25 = sshll.u32 %s696_s3, 4  ;;  %s412_s25 = int_to_ptr.vmem [resolvable:$true] %s411_s25 }
  0x4c   :  { %474 = vmatpush3.bf16.msra.mxu0 %v542_v1  ;;  %494 = vmatpush3.bf16.msra.mxu1 %v550_v4  ;;  %v547_v9 = vld [vmem:[#allocation5 + $0x28] sm:$0xff]   ;;  %v553_v10 = vld [vmem:[#allocation7 + $0x18] sm:$0xff]   ;;  %v548_v11 = vld [vmem:[#allocation5 + $0x30] sm:$0xff]   ;;  %s658_s26 = scalar_lea.vmem %s412_s25, 128  ;;  %p663_p5 = scmp.lt.s32.totalorder %s412_s25, %s412_s25 }
  0x4d   :  { %475 = vmatprep.subr.bf16.mxu0 %v694_v0  ;;  %495 = vmatprep.subr.bf16.mxu1 %v694_v0  ;;  %v554_v12 = vld [vmem:[#allocation7 + $0x20] sm:$0xff]   ;;  %v549_v13 = vld [vmem:[#allocation5 + $0x38] sm:$0xff]   ;;  %v555_v14 = vld [vmem:[#allocation7 + $0x28] sm:$0xff]   ;;  %vm392_vm1 = vcmp.lt.s32.totalorder %v391_v39, 16  ;;  %p659_p4 = scmp.ne.s32.totalorder %s412_s25, %s658_s26  ;;  %p664_p6 = scmp.lt.s32.totalorder %s658_s26, %s658_s26 }
  0x4e   :  { %v72_v15 = vld [vmem:[#allocation2] sm:$0xf]  ;;  %v556_v16 = vld [vmem:[#allocation7 + $0x30] sm:$0xff]   ;;  %v558_v18 = vld [vmem:[#allocation8] sm:$0xff]  }
  0x4f   :  { %v557_v17 = vld [vmem:[#allocation7 + $0x38] sm:$0xff]   ;;  %v559_v19 = vld [vmem:[#allocation8 + $0x8] sm:$0xff]   ;;  %v560_v20 = vld [vmem:[#allocation8 + $0x10] sm:$0xff]   ;;  %p665_p7 = por %p664_p6, %p663_p5 }
  0x50   :  { %476 = vmatpush3.bf16.msra.mxu0 %v543_v2  ;;  %496 = vmatpush3.bf16.msra.mxu1 %v551_v6  ;;  %v561_v21 = vld [vmem:[#allocation8 + $0x18] sm:$0xff]   ;;  %v562_v22 = vld [vmem:[#allocation8 + $0x20] sm:$0xff]   ;;  %v563_v23 = vld [vmem:[#allocation8 + $0x28] sm:$0xff]  }
  0x51   :  { %477 = vmatprep.subr.bf16.mxu0 %v694_v0  ;;  %497 = vmatprep.subr.bf16.mxu1 %v694_v0  ;;  %v564_v24 = vld [vmem:[#allocation8 + $0x30] sm:$0xff]   ;;  %v565_v31 = vld [vmem:[#allocation8 + $0x38] sm:$0xff]   ;;  %p666_p8 = pnand %p665_p7, %p659_p4 }
  0x54   :  { %478 = vmatpush3.bf16.msra.mxu0 %v544_v3  ;;  %498 = vmatpush3.bf16.msra.mxu1 %v552_v8 }
  0x55   :  { %479 = vmatprep.subr.bf16.mxu0 %v694_v0  ;;  %499 = vmatprep.subr.bf16.mxu1 %v694_v0 }
  0x58   :  { %480 = vmatpush3.bf16.msra.mxu0 %v545_v5  ;;  %500 = vmatpush3.bf16.msra.mxu1 %v553_v10 }
  0x59   :  { %481 = vmatprep.subr.bf16.mxu0 %v694_v0  ;;  %501 = vmatprep.subr.bf16.mxu1 %v694_v0 }
  0x5c   :  { %482 = vmatpush3.bf16.msra.mxu0 %v546_v7  ;;  %502 = vmatpush3.bf16.msra.mxu1 %v554_v12 }
  0x5d   :  { %483 = vmatprep.subr.bf16.mxu0 %v694_v0  ;;  %503 = vmatprep.subr.bf16.mxu1 %v694_v0 }
  0x60   :  { %484 = vmatpush3.bf16.msra.mxu0 %v547_v9  ;;  %504 = vmatpush3.bf16.msra.mxu1 %v555_v14 }
  0x61   :  { %485 = vmatprep.subr.bf16.mxu0 %v694_v0  ;;  %505 = vmatprep.subr.bf16.mxu1 %v694_v0 }
  0x64   :  { %486 = vmatpush3.bf16.msra.mxu0 %v548_v11  ;;  %506 = vmatpush3.bf16.msra.mxu1 %v556_v16 }
  0x65   :  { %487 = vmatprep.subr.bf16.mxu0 %v694_v0  ;;  %507 = vmatprep.subr.bf16.mxu1 %v694_v0 }
  0x68   :  { %488 = vmatpush3.bf16.msra.mxu0 %v549_v13  ;;  %508 = vmatpush3.bf16.msra.mxu1 %v557_v17 }
  0x69   :  { %513 = vmatprep.subr.bf16.mxu0 %v694_v0 }
  0x6b   :  { %490 = vmatmul.mubr.bf16.vlgmr.msra.gmra.mrb[0].mxu0 %v72_v15 }
  0x6c   :  { %529 = vmatprep.mubr.msk.bf16.mxu0 %vm695_vm0, %v694_v0  ;;  %514 = vmatpush3.bf16.msra.mxu0 %v558_v18 }
  0x6d   :  { %515 = vmatprep.subr.bf16.mxu0 %v694_v0 }
  0x70   :  { %516 = vmatpush3.bf16.msra.mxu0 %v559_v19 }
  0x71   :  { %517 = vmatprep.subr.bf16.mxu0 %v694_v0 }
  0x74   :  { %518 = vmatpush3.bf16.msra.mxu0 %v560_v20 }
  0x75   :  { %519 = vmatprep.subr.bf16.mxu0 %v694_v0 }
  0x78   :  { %520 = vmatpush3.bf16.msra.mxu0 %v561_v21 }
  0x79   :  { %521 = vmatprep.subr.bf16.mxu0 %v694_v0 }
  0x7c   :  { %522 = vmatpush3.bf16.msra.mxu0 %v562_v22 }
  0x7d   :  { %523 = vmatprep.subr.bf16.mxu0 %v694_v0 }
  0x80   :  { %524 = vmatpush3.bf16.msra.mxu0 %v563_v23 }
  0x81   :  { %525 = vmatprep.subr.bf16.mxu0 %v694_v0 }
  0x84   :  { %526 = vmatpush3.bf16.msra.mxu0 %v564_v24 }
  0x85   :  { %527 = vmatprep.subr.bf16.mxu0 %v694_v0 }
  0x88   :  { %528 = vmatpush3.bf16.msra.mxu0 %v565_v31 }
 0x13e   :  { %v171_v25 = vpop.f32.mrb[0].mxu0 }
 0x13f   :  { %v177_v26 = vmax.f32 %v171_v25, 0.0  ;;  %v491_v27 = vpop.f32.mrb[1].mxu0 }
 0x140   :  { %v174_v28 = vpop.f32.mrb[2].mxu0 }
 0x141   :  { %v178_v29 = vpack.c.bf16 %v177_v26, %v177_v26  ;;  %v492_v30 = vpop.f32.mrb[3].mxu0 }
 0x143   :  { %510 = vmatmul.mubr.bf16.vlgmr.msra.gmra.mrb[0].mxu1 %v178_v29 }
 0x216   :  { %v277_v32 = vpop.f32.mrb[0].mxu1 }
 0x217   :  { %v283_v33 = vmax.f32 %v277_v32, 0.0  ;;  %v511_v34 = vpop.f32.mrb[1].mxu1 }
 0x218   :  { %v280_v35 = vpop.f32.mrb[2].mxu1 }
 0x219   :  { %v284_v36 = vpack.c.bf16 %v283_v33, %v283_v33  ;;  %v512_v37 = vpop.f32.mrb[3].mxu1 }
 0x21b   :  { %530 = vmatmul.mubr.bf16.vlgmr.msra.gmra.mrb[4].mxu0 %v284_v36 }
 0x2ee   :  { %v383_v40 = vpop.f32.mrb[4].mxu0 }
 0x2ef   :  { %v389_v41 = vmax.f32 %v383_v40, 0.0  ;;  %v531_v42 = vpop.f32.mrb[5].mxu0 }
 0x2f0   :  { %v386_v43 = vpop.f32.mrb[6].mxu0 }
 0x2f1   :  { %v532_v44 = vpop.f32.mrb[7].mxu0  ;;  %v393_v45 = vsel %vm392_vm1, %v389_v41, -1e+30 }
 0x2f2   :  { %394 = vmax.xlane.f32.xlu0 %v393_v45 }
 0x37f   :  { %v395_v46 = vpop.xlane.xlu0 %394 }
 0x380   :  { %v396_v47 = vsub.f32 %v393_v45, %v395_v46 }
 0x382   :  { %v397_v48 = vmul.f32 1.442695, %v396_v47 }
 0x384   :  { %566 = vpow2.f32 %v397_v48 }
 0x38e   :  { %v567_v49 = vpop.eup %566 }
 0x38f   :  { %399 = vadd.xlane.f32.xlu0 %v567_v49 }
 0x41c   :  { %v400_v50 = vpop.xlane.xlu0 %399 }
 0x41d   :  { %568 = vlog2.f32 %v400_v50 }
 0x427   :  { %v569_v51 = vpop.eup %568 }
 0x428   :  { %v402_v52 = vmul.f32 0.6931472, %v569_v51 }
 0x42a   :  { %v403_v53 = vsub.f32 %v396_v47, %v402_v52 }
 0x42c   :  { %404 = vst [vmem:[#allocation10] sm:$0xff] %v403_v53 }
 0x42d   :  { %669 = shalt.err (!%p666_p8)
}
 0x42e   :  { %s670_s1 = scalar_lea.hbm %s825_s4, 128 }
 0x42f   :  { %p671_p9 = scmp.ne.s32.totalorder %s825_s4, %s670_s1  ;;  %p674_p10 = scmp.lt.u32.totalorder %s670_s1, %s825_s4 }
 0x431   :  { %p676_p11 = pnand %p674_p10, %p671_p9 }
 0x433   :  { %679 = shalt.err (!%p676_p11)
}
 0x434   :  { %414 = dma.vmem_to_hbm [thread:$0]  %s412_s25, 128, %s825_s4, [#allocation4]  }
 0x435   :  { %686 = dma.done.wait [#allocation4], 128  }
 0x436   :  { %687 = vsyncadd [#allocation4], 4294967168 }
 0x437   :  { %418 = vsyncpa [#allocation3], 1 }
 0x438   :  { %419 = vsyncpa [#allocation6], 1 }
 0x439   :  { %420 = vsyncpa [#allocation9], 1 }
 0x43a   :  { %421 = vsyncpa [#allocation4], 1 }

</bundles_post_ra>
